<compile_context>
chip_gen: v5e
topology: v5e:2x2
jax: 0.10.0
libtpu: 0.0.40
codegen_flags: <defaults>
</compile_context>

<pallas_src>
import jax
import jax.numpy as jnp
from jax.experimental import pallas as pl
from jax.experimental.pallas import tpu as pltpu

_H1 = 128      # layer1 output width (== lane width)
_H2 = 64       # layer2 output width
_LANES = 128   # lane width of the packed parameter buffer


def _round_up(x, m):
    return ((x + m - 1) // m) * m


def _param_layout(state_dim, action_dim):
    """Row offsets inside the packed (rows, 128) parameter buffer."""
    d_in = state_dim + action_dim
    d_pad = _round_up(d_in, 8)            # x is padded to d_pad columns; W1 pad rows stay 0
    r_b1 = d_pad                          # bias-1 row
    r_w2 = _round_up(r_b1 + 1, 8)         # W2 starts on an 8-row boundary (zero-cost slice)
    r_b2 = r_w2 + _H1                     # bias-2 row (+ ones feature at lane 64)
    r_w3 = r_b2 + 1                       # w3 row (+ b3 at lane 64)
    rows = _round_up(r_w3 + 1, 8)
    return d_pad, r_b1, r_w2, r_b2, r_w3, rows


def pack_critic_params(params, state_dim, action_dim):
    """Pack (w1,b1,w2,b2,w3,b3) into a single lane-dense (rows,128) f32 buffer.

    w* are (in_features, out_features), b* are (out_features,).
    NOTE: the padded region must stay exactly 0 / 1.0 (bias-folding trick);
    re-pack after any parameter update rather than writing in place.
    """
    w1, b1, w2, b2, w3, b3 = params
    d_in = state_dim + action_dim
    d_pad, r_b1, r_w2, r_b2, r_w3, rows = _param_layout(state_dim, action_dim)
    p = jnp.zeros((rows, _LANES), jnp.float32)
    p = p.at[0:d_in, :].set(w1.astype(jnp.float32))        # W1  (d_in, 128)
    p = p.at[r_b1, :].set(b1.astype(jnp.float32))          # b1  (128,)
    p = p.at[r_w2:r_w2 + _H1, 0:_H2].set(w2.astype(jnp.float32))   # W2 (128,64) zero-padded
    p = p.at[r_b2, 0:_H2].set(b2.astype(jnp.float32))      # b2  (64,)
    p = p.at[r_b2, _H2].set(1.0)                           # ones feature -> carries b3 to layer 3
    p = p.at[r_w3, 0:_H2].set(w3[:, 0].astype(jnp.float32))  # w3 row (64,)
    p = p.at[r_w3, _H2].set(b3[0].astype(jnp.float32))     # b3 scalar
    return p


def _make_critic_kernel(d_pad, r_b1, r_w2, r_b2, r_w3):
    def kernel(x_ref, p_ref, o_ref):
        x = x_ref[...]                                          # (bb, d_pad) padded concat input
        # ---- Layer 1 (MXU): (bb, d_pad) @ (d_pad, 128) + b1 ----
        h1 = jnp.dot(x, p_ref[0:d_pad, :], preferred_element_type=jnp.float32)
        h1 = jnp.maximum(h1 + p_ref[r_b1:r_b1 + 1, :], 0.0)     # (bb, 128)
        # ---- Layer 2 (MXU): 128 -> 64, zero-padded to 128 output lanes ----
        h2 = jnp.dot(h1, p_ref[r_w2:r_w2 + _H1, :], preferred_element_type=jnp.float32)
        h2 = jnp.maximum(h2 + p_ref[r_b2:r_b2 + 1, :], 0.0)     # (bb, 128); lane 64 == 1.0
        # ---- Layer 3 (VPU + XLU): N=1 "matmul" as multiply + lane reduction.
        # The ones feature at lane 64 times the w3-row lane 64 (= b3) folds the bias in.
        q = jnp.sum(h2 * p_ref[r_w3:r_w3 + 1, :], axis=-1, keepdims=True)
        o_ref[...] = q.astype(o_ref.dtype)                      # (bb, 1)
    return kernel


def _choose_blocks(b):
    """Pick (batch_block, n_blocks).

    Big blocks amortize the ~0.35us/step serial grid cost (v5e/v6e); an even
    block count >= 2 (for B > 256) lets v7x shard across both TensorCores.
    """
    if b <= 256:
        return _round_up(max(b, 8), 8), 1
    target_bb = 1024
    n = pl.cdiv(b, target_bb)
    if n < 2:
        n = 2
    elif n % 2:
        n += 1
    bb = _round_up(pl.cdiv(b, n), 8)
    return bb, n


def critic_forward(state, action, packed_params):
    """state: (B, state_dim) f32, action: (B, action_dim) f32 -> (B, 1) f32."""
    state = state.astype(jnp.float32)
    action = action.astype(jnp.float32)
    b, ds_ = state.shape
    _, da = action.shape
    d_in = ds_ + da
    d_pad, r_b1, r_w2, r_b2, r_w3, rows = _param_layout(ds_, da)

    bb, n_blocks = _choose_blocks(b)
    b_pad = bb * n_blocks

    # Fused concat + pad on the XLA side: one compact (B_pad, d_pad) input with
    # contiguous rows -> a single input DMA stream per block, half the operands.
    x = jnp.concatenate([state, action], axis=1)
    x = jnp.pad(x, ((0, b_pad - b), (0, d_pad - d_in)))

    kernel = _make_critic_kernel(d_pad, r_b1, r_w2, r_b2, r_w3)

    q = pl.pallas_call(
        kernel,
        out_shape=jax.ShapeDtypeStruct((b_pad, 1), jnp.float32),
        grid=(n_blocks,),
        in_specs=[pl.BlockSpec((bb, d_pad), lambda i: (i, 0)),
                  pl.BlockSpec((rows, _LANES), lambda i: (0, 0))],   # constant -> fetched once
        out_specs=pl.BlockSpec((bb, 1), lambda i: (i, 0)),
        compiler_params=pltpu.CompilerParams(
            dimension_semantics=("parallel",),
            vmem_limit_bytes=32 * 1024 * 1024),
    )(x, packed_params)

    # TODO(synk): for the full DDPG update step, fuse actor + critic +
    # target-critic forwards (which share state/action) into one pallas_call to
    # amortize launch/DMA overhead across the networks.
    return q[:b]


def init_critic_params(key, state_dim, action_dim):
    """PyTorch-style uniform(+-1/sqrt(fan_in)) init.

    Weights are (in_features, out_features); biases are (out_features,).
    """
    dims = [(state_dim + action_dim, _H1), (_H1, _H2), (_H2, 1)]
    params = []
    for fan_in, fan_out in dims:
        key, kw, kb = jax.random.split(key, 3)
        bound = 1.0 / jnp.sqrt(float(fan_in))
        w = jax.random.uniform(kw, (fan_in, fan_out), jnp.float32, -bound, bound)
        bvec = jax.random.uniform(kb, (fan_out,), jnp.float32, -bound, bound)
        params.extend([w, bvec])
    return tuple(params)


def _reference_forward(state, action, raw_params):
    w1, b1, w2, b2, w3, b3 = raw_params
    x = jnp.concatenate([state, action], axis=1)
    h1 = jnp.maximum(x @ w1 + b1, 0.0)
    h2 = jnp.maximum(h1 @ w2 + b2, 0.0)
    return h2 @ w3 + b3


if __name__ == "__main__":
    state_dim, action_dim = 3, 1   # inverted pendulum: 3 obs, 1 torque

    key = jax.random.PRNGKey(0)
    kp, ks, ka, ks2, ka2 = jax.random.split(key, 5)
    raw_params = init_critic_params(kp, state_dim, action_dim)
    packed = pack_critic_params(raw_params, state_dim, action_dim)

    # Small batch: exercises the single-block path.
    batch = 8
    state = jax.random.normal(ks, (batch, state_dim), jnp.float32)
    action = jax.random.normal(ka, (batch, action_dim), jnp.float32)
    q = jax.block_until_ready(critic_forward(state, action, packed))
    q_ref = _reference_forward(state, action, raw_params)
    assert q.shape == (batch, 1)
    assert jnp.allclose(q, q_ref, atol=1e-4, rtol=1e-4)

    # Larger, unaligned batch: exercises the cdiv grid + batch-padding path
    # (2 blocks of 152 rows, parallel semantics, constant-param revisit).
    batch2 = 300
    state2 = jax.random.normal(ks2, (batch2, state_dim), jnp.float32)
    action2 = jax.random.normal(ka2, (batch2, action_dim), jnp.float32)
    q2 = jax.block_until_ready(critic_forward(state2, action2, packed))
    q2_ref = _reference_forward(state2, action2, raw_params)
    assert q2.shape == (batch2, 1)
    assert jnp.allclose(q2, q2_ref, atol=1e-4, rtol=1e-4)

    print("KERNEL_OK")
</pallas_src>

<mosaic_0001>
module attributes {stable_mosaic.version = 11 : i64} {
  func.func @kernel(%arg0: i32, %arg1: memref<8x8xf32, #tpu.memory_space<vmem>>, %arg2: memref<152x128xf32, #tpu.memory_space<vmem>>, %arg3: memref<8x1xf32, #tpu.memory_space<vmem>>) attributes {dimension_semantics = [#tpu.dimension_semantics<parallel>], iteration_bounds = array<i64: 1>, scalar_prefetch = 0 : i64, scratch_operands = 0 : i64, tpu.core_type = #tpu.core_type<tc>, window_params = [{transform_indices = @transform_0, window_bounds = array<i64: 8, 8>}, {pipeline_mode = #tpu.pipeline_mode<synchronous>, transform_indices = @transform_1, window_bounds = array<i64: 152, 128>}, {transform_indices = @transform_2, window_bounds = array<i64: 8, 1>}]} {
    %c0 = arith.constant 0 : index
    %c0_0 = arith.constant 0 : index
    %0 = vector.load %arg1[%c0, %c0_0] : memref<8x8xf32, #tpu.memory_space<vmem>>, vector<8x8xf32>
    %c0_1 = arith.constant 0 : index
    %c0_2 = arith.constant 0 : index
    %1 = vector.load %arg2[%c0_1, %c0_2] : memref<152x128xf32, #tpu.memory_space<vmem>>, vector<8x128xf32>
    %cst = arith.constant dense<0.000000e+00> : vector<8x128xf32>
    %2 = tpu.matmul %0, %1, %cst {dimension_numbers = #tpu.dot_dimension_numbers<[1], [0], [0], [1], [0, 0, 1, 1], [], []>} : vector<8x8xf32>, vector<8x128xf32>, vector<8x128xf32> -> vector<8x128xf32>
    %c8 = arith.constant 8 : index
    %c0_3 = arith.constant 0 : index
    %3 = vector.load %arg2[%c8, %c0_3] : memref<152x128xf32, #tpu.memory_space<vmem>>, vector<1x128xf32>
    %4 = vector.broadcast %3 : vector<1x128xf32> to vector<8x128xf32>
    %5 = arith.addf %2, %4 : vector<8x128xf32>
    %cst_4 = arith.constant 0.000000e+00 : f32
    %6 = vector.broadcast %cst_4 : f32 to vector<8x128xf32>
    %7 = arith.maximumf %5, %6 : vector<8x128xf32>
    %c16 = arith.constant 16 : index
    %c0_5 = arith.constant 0 : index
    %8 = vector.load %arg2[%c16, %c0_5] : memref<152x128xf32, #tpu.memory_space<vmem>>, vector<128x128xf32>
    %cst_6 = arith.constant dense<0.000000e+00> : vector<8x128xf32>
    %9 = tpu.matmul %7, %8, %cst_6 {dimension_numbers = #tpu.dot_dimension_numbers<[1], [0], [0], [1], [0, 0, 1, 1], [], []>} : vector<8x128xf32>, vector<128x128xf32>, vector<8x128xf32> -> vector<8x128xf32>
    %c144 = arith.constant 144 : index
    %c0_7 = arith.constant 0 : index
    %10 = vector.load %arg2[%c144, %c0_7] : memref<152x128xf32, #tpu.memory_space<vmem>>, vector<1x128xf32>
    %11 = vector.broadcast %10 : vector<1x128xf32> to vector<8x128xf32>
    %12 = arith.addf %9, %11 : vector<8x128xf32>
    %cst_8 = arith.constant 0.000000e+00 : f32
    %13 = vector.broadcast %cst_8 : f32 to vector<8x128xf32>
    %14 = arith.maximumf %12, %13 : vector<8x128xf32>
    %c145 = arith.constant 145 : index
    %c0_9 = arith.constant 0 : index
    %15 = vector.load %arg2[%c145, %c0_9] : memref<152x128xf32, #tpu.memory_space<vmem>>, vector<1x128xf32>
    %16 = vector.broadcast %15 : vector<1x128xf32> to vector<8x128xf32>
    %17 = arith.mulf %14, %16 : vector<8x128xf32>
    %cst_10 = arith.constant dense<0.000000e+00> : vector<8xf32>
    %18 = vector.multi_reduction <add>, %17, %cst_10 [1] : vector<8x128xf32> to vector<8xf32>
    %19 = vector.shape_cast %18 : vector<8xf32> to vector<8x1xf32>
    %c0_11 = arith.constant 0 : index
    %c0_12 = arith.constant 0 : index
    %20 = vector.load %arg3[%c0_11, %c0_12] : memref<8x1xf32, #tpu.memory_space<vmem>>, vector<8x1xf32>
    tpu.vector_store %arg3[%c0_11, %c0_12], %19 {strides = array<i32>} : memref<8x1xf32, #tpu.memory_space<vmem>>, vector<8x1xf32>,
    return
  }
  func.func @transform_0(%arg0: i32) -> (i32, i32) {
    %c0_i32 = arith.constant 0 : i32
    %c0_i32_0 = arith.constant 0 : i32
    return %arg0, %c0_i32 : i32, i32
  }
  func.func @transform_1(%arg0: i32) -> (i32, i32) {
    %c0_i32 = arith.constant 0 : i32
    %c0_i32_0 = arith.constant 0 : i32
    %c0_i32_1 = arith.constant 0 : i32
    return %c0_i32, %c0_i32_0 : i32, i32
  }
  func.func @transform_2(%arg0: i32) -> (i32, i32) {
    %c0_i32 = arith.constant 0 : i32
    %c0_i32_0 = arith.constant 0 : i32
    return %arg0, %c0_i32 : i32, i32
  }
}

</mosaic_0001>

<bundles_post_ra>
// kernel: tpu_custom_call.1
= control target key start
LH: loop header
LB: loop body
LE: loop exit
PB: predicated region body
PF: predicated region fallthrough
CT: control target
= control target key end

     0   :  { %7 = vsyncpa [#allocation3], 0  ;;  %s210_s0 = inlined_call_operand.hbm [shape: f32[8,8], index: 0, kind: input, shape index: {}]   ;;  %s211_s1 = inlined_call_operand.hbm [shape: f32[152,128], index: 1, kind: input, shape index: {}]   ;;  %s212_s2 = inlined_call_operand.vmem [shape: f32[8,1], index: 2, kind: output, shape index: {}]  }
   0x1   :  { %s14_s11 = sshll.u32 %s210_s0, 4  ;;  %s15_s11 = int_to_ptr.hbm [resolvable:$true] %s14_s11 }
   0x2   :  { %8 = vsyncpa [#allocation5], 0  ;;  %s182_s12 = smov [#allocation2]   ;;  %s24_s16 = sshll.u32 %s211_s1, 4  ;;  %s25_s16 = int_to_ptr.hbm [resolvable:$true] %s24_s16 }
   0x3   :  { %s16_s13 = sshll.u32 %s182_s12, 4  ;;  %s183_s17 = smov [#allocation4]   ;;  %s17_s13 = int_to_ptr.vmem [resolvable:$true] %s16_s13 }
   0x4   :  { %19 = dma.hbm_to_vmem [thread:$0]  %s15_s11, 128, %s17_s13, [#allocation3]  }
   0x5   :  { %s26_s18 = sshll.u32 %s183_s17, 4  ;;  %s184_s19 = smov 128   ;;  %s27_s18 = int_to_ptr.vmem [resolvable:$true] %s26_s18 }
   0x6   :  { %s185_s20 = smov 8  }
   0x7   :  { %32 = dma.hbm_to_vmem [thread:$0]  %s25_s16, 2432, %s27_s18, [#allocation5], %s184_s19, %s184_s19, %s185_s20  }
   0x8   :  { %178 = dma.done.wait [#allocation3], 128  }
   0x9   :  { %179 = vsyncadd [#allocation3], 4294967168 }
   0xa   :  { %180 = dma.done.wait [#allocation5], 2432  }
   0xb   :  { %181 = vsyncadd [#allocation5], 4294964864  ;;  %vm45_vm0 = vcmask 64512   ;;  %v42_v0 = vld [vmem:[#allocation4] sm:$0xff]  ;;  %v41_v1 = vld [vmem:[#allocation2] sm:$0xff]  ;;  %vm114_vm1 = vcmask 7168  }
   0xc   :  { %v85_v2 = vld [vmem:[#allocation4 + $0x88] sm:$0xff]  ;;  %64 = vmatpush.msra.mxu0 %v42_v0  ;;  %v84_v3 = vld [vmem:[#allocation4 + $0x80] sm:$0xff]  ;;  %v83_v4 = vld [vmem:[#allocation4 + $0x78] sm:$0xff] }
   0xd   :  { %88 = vmatpush.msra.mxu1 %v85_v2  ;;  %122 = vmatmul.msk.f32.vlgmr.msra.gmra.mxu0 %vm45_vm0, %v41_v1  ;;  %v82_v5 = vld [vmem:[#allocation4 + $0x70] sm:$0xff]  ;;  %v81_v6 = vld [vmem:[#allocation4 + $0x68] sm:$0xff]  ;;  %v80_v7 = vld [vmem:[#allocation4 + $0x60] sm:$0xff] }
   0xe   :  { %v79_v8 = vld [vmem:[#allocation4 + $0x58] sm:$0xff]  ;;  %v78_v9 = vld [vmem:[#allocation4 + $0x50] sm:$0xff]  ;;  %v77_v10 = vld [vmem:[#allocation4 + $0x48] sm:$0xff] }
   0xf   :  { %89 = vmatpush.msra.mxu1 %v84_v3  ;;  %v76_v11 = vld [vmem:[#allocation4 + $0x40] sm:$0xff]  ;;  %v75_v12 = vld [vmem:[#allocation4 + $0x38] sm:$0xff]  ;;  %v74_v13 = vld [vmem:[#allocation4 + $0x30] sm:$0xff] }
  0x10   :  { %v73_v14 = vld [vmem:[#allocation4 + $0x28] sm:$0xff]  ;;  %v72_v15 = vld [vmem:[#allocation4 + $0x20] sm:$0xff]  ;;  %v71_v16 = vld [vmem:[#allocation4 + $0x18] sm:$0xff] }
  0x11   :  { %90 = vmatpush.msra.mxu1 %v83_v4  ;;  %v70_v17 = vld [vmem:[#allocation4 + $0x10] sm:$0xff]  ;;  %v127_v18 = vld [vmem:[#allocation4 + $0x8] ss:$0 sm:$0xff] }
  0x12   :  { %v128_v22 = vld [vmem:[#allocation4 + $0x90] ss:$0 sm:$0xff]  ;;  %v129_v25 = vld [vmem:[#allocation4 + $0x91] ss:$0 sm:$0xff] }
  0x13   :  { %91 = vmatpush.msra.mxu1 %v82_v5 }
  0x15   :  { %92 = vmatpush.msra.mxu1 %v81_v6 }
  0x17   :  { %93 = vmatpush.msra.mxu1 %v80_v7 }
  0x19   :  { %94 = vmatpush.msra.mxu1 %v79_v8 }
  0x1b   :  { %95 = vmatpush.msra.mxu1 %v78_v9 }
  0x1d   :  { %96 = vmatpush.msra.mxu1 %v77_v10 }
  0x1f   :  { %97 = vmatpush.msra.mxu1 %v76_v11 }
  0x21   :  { %98 = vmatpush.msra.mxu1 %v75_v12 }
  0x23   :  { %99 = vmatpush.msra.mxu1 %v74_v13 }
  0x25   :  { %100 = vmatpush.msra.mxu1 %v73_v14 }
  0x27   :  { %101 = vmatpush.msra.mxu1 %v72_v15 }
  0x29   :  { %102 = vmatpush.msra.mxu1 %v71_v16 }
  0x2b   :  { %103 = vmatpush.msra.mxu1 %v70_v17 }
  0x8a   :  { %v66_v19 = vpop.f32.mrf.mxu0 }
  0x8b   :  { %v67_v20 = vadd.f32 %v127_v18, %v66_v19 }
  0x8d   :  { %v69_v21 = vmax.f32 %v67_v20, 0.0 }
  0x8f   :  { %104 = vmatmul.f32.vlgmr.msra.gmra.mxu1 %v69_v21 }
 0x10c   :  { %v105_v23 = vpop.f32.mrf.mxu1 }
 0x10d   :  { %v106_v24 = vadd.f32 %v128_v22, %v105_v23 }
 0x10f   :  { %v108_v26 = vmax.f32 %v106_v24, 0.0 }
 0x111   :  { %v111_v27 = vmul.f32 %v129_v25, %v108_v26 }
 0x113   :  { %112 = vadd.xlane.f32.xlu0 %v111_v27 }
 0x186   :  { %v113_v28 = vpop.xlane.xlu0 %112 }
 0x187   :  { %115 = vst.msk [vmem:[%s212_s2] sm:$0xff] %vm114_vm1, %v113_v28 }
 0x188   :  { %120 = vsyncpa [#allocation3], 1 }
 0x189   :  { %121 = vsyncpa [#allocation5], 1 }

</bundles_post_ra>
